<compile_context>
chip_gen: v6e
topology: v6e:2x2x1
jax: 0.10.0
libtpu: 0.0.40
codegen_flags: <defaults>
</compile_context>

<pallas_src>
import functools

import numpy as np
import jax
import jax.numpy as jnp
from jax.experimental import pallas as pl
from jax.experimental.pallas import tpu as pltpu

MV_DIM = 16
NUM_BASIS = 9


def _round_up(x: int, m: int) -> int:
    return (x + m - 1) // m * m


def make_pga_linear_basis() -> np.ndarray:
    """9 basis maps for Pin(3,0,1)-equivariant linear maps on 16-dim multivectors.

    Component ordering: [1, e0,e1,e2,e3, e01,e02,e03,e12,e13,e23, e012,e013,e023,e123, e0123]
    """
    basis = np.zeros((NUM_BASIS, MV_DIM, MV_DIM), dtype=np.float32)
    grades = [[0], [1, 2, 3, 4], [5, 6, 7, 8, 9, 10], [11, 12, 13, 14], [15]]
    # 5 grade projections
    for a, idxs in enumerate(grades):
        for i in idxs:
            basis[a, i, i] = 1.0
    # 4 maps  x -> e0 * <x>_k  (e0 is null, so e0*e0... terms vanish)
    e0_maps = {
        0: [(0, 1)],                       # 1    -> e0
        1: [(2, 5), (3, 6), (4, 7)],       # e_i  -> e0i
        2: [(8, 11), (9, 12), (10, 13)],   # e_ij -> e0ij
        3: [(14, 15)],                     # e123 -> e0123
    }
    for k, pairs in e0_maps.items():
        for (j, i) in pairs:
            basis[5 + k, i, j] = 1.0
    return basis


# ---------------------------------------------------------------------------
# Parameter folding (hoisted out of the forward path; run once per param set)
# ---------------------------------------------------------------------------
def fold_embedding_params(weight, bias_mv, mvs2s_w, mvs2s_b, basis):
    """Fold the equivariant basis into one fused (K, OMV + s_out) weight and bias.

    weight:   (C_out, C_in, 9)
    bias_mv:  (C_out,)          -- added to the scalar (index-0) mv component
    mvs2s_w:  (S_out, C_in)
    mvs2s_b:  (S_out,)
    basis:    (9, 16, 16)
    """
    c_out, c_in, _ = weight.shape
    s_out = mvs2s_w.shape[0]
    K = c_in * MV_DIM
    OMV = c_out * MV_DIM

    weight = weight.astype(jnp.float32)
    basis = basis.astype(jnp.float32)

    # W_mv[(x,j), (y,i)] = sum_a weight[y,x,a] * basis[a,i,j]
    w_mv = jnp.einsum("yxa,aij->xjyi", weight, basis).reshape(K, OMV)
    b_mv = (
        jnp.zeros((c_out, MV_DIM), jnp.float32)
        .at[:, 0].set(bias_mv.astype(jnp.float32))
        .reshape(OMV)
    )
    # scalar head reads only the j==0 component of each input mv channel
    w_s = (
        jnp.zeros((c_in, MV_DIM, s_out), jnp.float32)
        .at[:, 0, :].set(mvs2s_w.T.astype(jnp.float32))
        .reshape(K, s_out)
    )
    w_cat = jnp.concatenate([w_mv, w_s], axis=1)                        # (K, OMV + s_out)
    b_cat = jnp.concatenate([b_mv, mvs2s_b.astype(jnp.float32)])[None]  # (1, OMV + s_out)
    return w_cat, b_cat


# ---------------------------------------------------------------------------
# Kernel: single fused MXU dot, two lane-dense outputs (mv head, scalar head)
# ---------------------------------------------------------------------------
def _equi_linear_kernel(x_ref, w_ref, b_ref, o_mv_ref, o_s_ref):
    omv = o_mv_ref.shape[-1]
    y = jnp.dot(x_ref[...], w_ref[...], preferred_element_type=jnp.float32) + b_ref[...]
    o_mv_ref[...] = y[:, :omv].astype(o_mv_ref.dtype)
    o_s_ref[...] = y[:, omv:].astype(o_s_ref.dtype)


def _block_vmem_bytes(rows, cols, dtype):
    """(sublane, 128)-padded VMEM bytes of one buffered block."""
    itemsize = jnp.dtype(dtype).itemsize
    sublane = 8 * (4 // itemsize)        # 8 for f32, 16 for bf16
    return _round_up(max(rows, 1), sublane) * _round_up(max(cols, 1), 128) * itemsize


@functools.partial(jax.jit, static_argnames=("c_out", "s_out", "tile_n"))
def _embedding_forward(x_mv, w_cat, b_cat, *, c_out, s_out, tile_n=None):
    N, c_in, mv = x_mv.shape
    assert mv == MV_DIM
    K = c_in * MV_DIM
    OMV = c_out * MV_DIM
    OUT = OMV + s_out
    act_dtype = w_cat.dtype             # caller picks the streaming dtype via w_cat

    x_flat = x_mv.reshape(N, K).astype(act_dtype)

    # Token tile: large enough to amortize ~0.35us per grid step, clamped so the grid has
    # >= 2 steps (v7x's two TensorCores split the "parallel" axis).  Multiple of 16 so the
    # sublane dim is legal for both f32 (8) and packed bf16 (16) layouts.
    if tile_n is None:
        tile_n = 4096 if act_dtype == jnp.bfloat16 else 2048
    tn = min(_round_up(tile_n, 16), max(16, _round_up(pl.cdiv(N, 2), 16)))
    grid_n = pl.cdiv(N, tn)             # ragged N handled in-grid: last block is masked

    # Scoped-VMEM estimate with (sublane, 128) padding of every double-buffered block.
    est_vmem = (
        2 * _block_vmem_bytes(tn, K, act_dtype)         # x tile
        + 2 * _block_vmem_bytes(tn, OMV, act_dtype)     # mv output tile
        + 2 * _block_vmem_bytes(tn, s_out, act_dtype)   # scalar output tile (lane-padded)
        + 2 * _block_vmem_bytes(K, OUT, act_dtype)      # fused weight
        + 2 * _block_vmem_bytes(1, OUT, jnp.float32)    # bias (kept f32)
    )
    cp_kwargs = dict(dimension_semantics=("parallel",))
    if est_vmem > (12 << 20):           # v5e default scoped VMEM is 16 MiB; keep headroom
        cap = 48 << 20                  # safe even on v7x (64 MiB physical VMEM per TC)
        try:
            info = pltpu.get_tpu_info()
            phys = int(getattr(info, "vmem_capacity_bytes", 0))
            if phys:
                cap = min(max(phys - (16 << 20), cap), 100 << 20)
        except Exception:
            pass
        cp_kwargs["vmem_limit_bytes"] = min(est_vmem + (4 << 20), cap)

    itemsize = jnp.dtype(act_dtype).itemsize
    cost = pl.CostEstimate(
        flops=2 * N * K * OUT,
        transcendentals=0,
        bytes_accessed=itemsize * (N * K + K * OUT + N * OUT) + 4 * OUT,
    )

    out_mv, out_s = pl.pallas_call(
        _equi_linear_kernel,
        out_shape=(
            jax.ShapeDtypeStruct((N, OMV), act_dtype),
            jax.ShapeDtypeStruct((N, s_out), act_dtype),
        ),
        grid_spec=pltpu.PrefetchScalarGridSpec(
            num_scalar_prefetch=0,
            grid=(grid_n,),
            in_specs=[
                pl.BlockSpec((tn, K), lambda i: (i, 0)),
                pl.BlockSpec((K, OUT), lambda i: (0, 0)),
                pl.BlockSpec((1, OUT), lambda i: (0, 0)),
            ],
            out_specs=[
                pl.BlockSpec((tn, OMV), lambda i: (i, 0)),     # lane-dense mv head
                pl.BlockSpec((tn, s_out), lambda i: (i, 0)),   # small scalar head
            ],
        ),
        compiler_params=pltpu.CompilerParams(**cp_kwargs),
        cost_estimate=cost,
    )(x_flat, w_cat, b_cat)

    return out_mv.reshape(N, c_out, MV_DIM), out_s


def rad_equivariant_erwin_embedding(x_mv, weight, bias_mv, mvs2s_w, mvs2s_b, basis, *,
                                    tile_n=None, activation_dtype=jnp.float32):
    """Convenience wrapper: fold params (once) + fused forward.

    In a real model, call fold_embedding_params() once per parameter set and reuse
    (w_cat, b_cat) across forwards; this wrapper re-folds for self-containment.
    activation_dtype=jnp.bfloat16 halves HBM traffic (f32 accumulation is kept).
    """
    c_out = weight.shape[0]
    s_out = mvs2s_w.shape[0]
    w_cat, b_cat = fold_embedding_params(weight, bias_mv, mvs2s_w, mvs2s_b, basis)
    w_cat = w_cat.astype(activation_dtype)     # bias stays f32 (added to f32 accumulator)
    return _embedding_forward(x_mv, w_cat, b_cat, c_out=c_out, s_out=s_out, tile_n=tile_n)


def reference(x_mv, weight, bias_mv, mvs2s_w, mvs2s_b, basis):
    omv = jnp.einsum("yxa,aij,nxj->nyi", weight, basis, x_mv)
    omv = omv.at[..., 0].add(bias_mv)
    os = x_mv[..., 0] @ mvs2s_w.T + mvs2s_b
    return omv, os


# TODO(synk): EquiLayerNorm, the GATr ball self-attention (distance-biased attention over
# multivector channels) and the GeoMLP geometric bilinears of EquivariantErwinBlock are not
# kernelized here; only the EquiLinear projection hot path is implemented.

if __name__ == "__main__":
    # Small, deterministic example; N intentionally NOT a multiple of 8/128 to exercise
    # the in-grid ragged-N (masked partial block) path.
    N, IN_MV, OUT_MV, OUT_S = 300, 4, 8, 16

    key = jax.random.PRNGKey(0)
    k1, k2, k3, k4, k5 = jax.random.split(key, 5)

    x_mv = jax.random.normal(k1, (N, IN_MV, MV_DIM), jnp.float32)
    weight = 0.1 * jax.random.normal(k2, (OUT_MV, IN_MV, NUM_BASIS), jnp.float32)
    bias_mv = 0.1 * jax.random.normal(k3, (OUT_MV,), jnp.float32)
    mvs2s_w = 0.1 * jax.random.normal(k4, (OUT_S, IN_MV), jnp.float32)
    mvs2s_b = 0.1 * jax.random.normal(k5, (OUT_S,), jnp.float32)

    basis = jnp.asarray(make_pga_linear_basis())

    ref_mv, ref_s = reference(x_mv, weight, bias_mv, mvs2s_w, mvs2s_b, basis)

    # f32 streaming path (tight tolerances).
    out_mv, out_s = rad_equivariant_erwin_embedding(
        x_mv, weight, bias_mv, mvs2s_w, mvs2s_b, basis)
    out_mv = jax.block_until_ready(out_mv)
    out_s = jax.block_until_ready(out_s)
    np.testing.assert_allclose(np.asarray(out_mv), np.asarray(ref_mv), rtol=1e-5, atol=1e-5)
    np.testing.assert_allclose(np.asarray(out_s), np.asarray(ref_s), rtol=1e-5, atol=1e-5)

    # bf16 activation-streaming path (halves HBM traffic; looser tolerances).
    out_mv_bf, out_s_bf = rad_equivariant_erwin_embedding(
        x_mv, weight, bias_mv, mvs2s_w, mvs2s_b, basis, activation_dtype=jnp.bfloat16)
    out_mv_bf = jax.block_until_ready(out_mv_bf)
    out_s_bf = jax.block_until_ready(out_s_bf)
    np.testing.assert_allclose(np.asarray(out_mv_bf.astype(jnp.float32)),
                               np.asarray(ref_mv), rtol=6e-2, atol=6e-2)
    np.testing.assert_allclose(np.asarray(out_s_bf.astype(jnp.float32)),
                               np.asarray(ref_s), rtol=6e-2, atol=6e-2)

    print("KERNEL_OK")
</pallas_src>

<mosaic_0001>
module attributes {stable_mosaic.version = 11 : i64} {
  func.func @_equi_linear_kernel(%arg0: i32, %arg1: memref<160x64xf32, #tpu.memory_space<vmem>>, %arg2: memref<64x144xf32, #tpu.memory_space<vmem>>, %arg3: memref<1x144xf32, #tpu.memory_space<vmem>>, %arg4: memref<160x128xf32, #tpu.memory_space<vmem>>, %arg5: memref<160x16xf32, #tpu.memory_space<vmem>>) attributes {dimension_semantics = [#tpu.dimension_semantics<parallel>], iteration_bounds = array<i64: 2>, scalar_prefetch = 0 : i64, scratch_operands = 0 : i64, tpu.core_type = #tpu.core_type<tc>, window_params = [{transform_indices = @transform_0, window_bounds = array<i64: 160, 64>}, {pipeline_mode = #tpu.pipeline_mode<synchronous>, transform_indices = @transform_1, window_bounds = array<i64: 64, 144>}, {pipeline_mode = #tpu.pipeline_mode<synchronous>, transform_indices = @transform_2, window_bounds = array<i64: 1, 144>}, {transform_indices = @transform_3, window_bounds = array<i64: 160, 128>}, {transform_indices = @transform_4, window_bounds = array<i64: 160, 16>}]} {
    %c0 = arith.constant 0 : index
    %c0_0 = arith.constant 0 : index
    %0 = vector.load %arg1[%c0, %c0_0] : memref<160x64xf32, #tpu.memory_space<vmem>>, vector<160x64xf32>
    %c0_1 = arith.constant 0 : index
    %c0_2 = arith.constant 0 : index
    %1 = vector.load %arg2[%c0_1, %c0_2] : memref<64x144xf32, #tpu.memory_space<vmem>>, vector<64x144xf32>
    %cst = arith.constant dense<0.000000e+00> : vector<160x144xf32>
    %2 = tpu.matmul %0, %1, %cst {dimension_numbers = #tpu.dot_dimension_numbers<[1], [0], [0], [1], [0, 0, 1, 1], [], []>} : vector<160x64xf32>, vector<64x144xf32>, vector<160x144xf32> -> vector<160x144xf32>
    %c0_3 = arith.constant 0 : index
    %c0_4 = arith.constant 0 : index
    %3 = vector.load %arg3[%c0_3, %c0_4] : memref<1x144xf32, #tpu.memory_space<vmem>>, vector<1x144xf32>
    %4 = vector.broadcast %3 : vector<1x144xf32> to vector<160x144xf32>
    %5 = arith.addf %2, %4 : vector<160x144xf32>
    %6 = vector.extract_strided_slice %5 {offsets = [0, 0], sizes = [160, 128], strides = [1, 1]} : vector<160x144xf32> to vector<160x128xf32>
    %c0_5 = arith.constant 0 : index
    %c0_6 = arith.constant 0 : index
    %7 = vector.load %arg4[%c0_5, %c0_6] : memref<160x128xf32, #tpu.memory_space<vmem>>, vector<160x128xf32>
    tpu.vector_store %arg4[%c0_5, %c0_6], %6 {strides = array<i32>} : memref<160x128xf32, #tpu.memory_space<vmem>>, vector<160x128xf32>,
    %8 = vector.extract_strided_slice %5 {offsets = [0, 128], sizes = [160, 16], strides = [1, 1]} : vector<160x144xf32> to vector<160x16xf32>
    %c0_7 = arith.constant 0 : index
    %c0_8 = arith.constant 0 : index
    %9 = vector.load %arg5[%c0_7, %c0_8] : memref<160x16xf32, #tpu.memory_space<vmem>>, vector<160x16xf32>
    tpu.vector_store %arg5[%c0_7, %c0_8], %8 {strides = array<i32>} : memref<160x16xf32, #tpu.memory_space<vmem>>, vector<160x16xf32>,
    return
  }
  func.func @transform_0(%arg0: i32) -> (i32, i32) {
    %c0_i32 = arith.constant 0 : i32
    %c0_i32_0 = arith.constant 0 : i32
    return %arg0, %c0_i32 : i32, i32
  }
  func.func @transform_1(%arg0: i32) -> (i32, i32) {
    %c0_i32 = arith.constant 0 : i32
    %c0_i32_0 = arith.constant 0 : i32
    %c0_i32_1 = arith.constant 0 : i32
    return %c0_i32, %c0_i32_0 : i32, i32
  }
  func.func @transform_2(%arg0: i32) -> (i32, i32) {
    %c0_i32 = arith.constant 0 : i32
    %c0_i32_0 = arith.constant 0 : i32
    %c0_i32_1 = arith.constant 0 : i32
    return %c0_i32, %c0_i32_0 : i32, i32
  }
  func.func @transform_3(%arg0: i32) -> (i32, i32) {
    %c0_i32 = arith.constant 0 : i32
    %c0_i32_0 = arith.constant 0 : i32
    return %arg0, %c0_i32 : i32, i32
  }
  func.func @transform_4(%arg0: i32) -> (i32, i32) {
    %c0_i32 = arith.constant 0 : i32
    %c0_i32_0 = arith.constant 0 : i32
    return %arg0, %c0_i32 : i32, i32
  }
}

</mosaic_0001>

<bundles_post_ra>
// kernel: _embedding_forward.1
= control target key start
LH: loop header
LB: loop body
LE: loop exit
PB: predicated region body
PF: predicated region fallthrough
CT: control target
= control target key end

     0   :  { %s1538_s15 = smov 0   ;;  %s1540_s16 = smov 0   ;;  %s1973_s0 = inlined_call_operand.vmem [shape: f32[300,64], index: 0, kind: input, shape index: {}]   ;;  %s1974_s1 = inlined_call_operand.vmem [shape: f32[64,144], index: 1, kind: input, shape index: {}]   ;;  %s1975_s2 = inlined_call_operand.vmem [shape: f32[1,144], index: 2, kind: input, shape index: {}]   ;;  %s1976_s3 = inlined_call_operand.vmem [shape: f32[300,128], index: 3, kind: output, shape index: {0}]   ;;  %s1977_s4 = inlined_call_operand.vmem [shape: f32[300,16], index: 4, kind: output, shape index: {1}]  }
   0x1   :  { %s1542_s17 = smov 0  }
   0x2 LB: > { %s1551_s18 = sadd.s32 4294967295, %s1446_s17   ;;  %s1553_s19 = sadd.s32 1, %s1446_s17   ;;  %s1446_s17 = sphi %s1542_s17, %s1987_s17   ;;  %s1442_s16 = sphi %s1540_s16, %s1986_s16   ;;  %s1438_s15 = sphi %s1538_s15, %s1985_s15  }
   0x3   : > { %s87_s20 = ssub.s32 %s1446_s17, %s1553_s19  ;;  %s90_s21 = sadd.s32 1, %s1442_s16 }
   0x4   : > { %p88_p0 = scmp.eq.s32.totalorder %s87_s20, 0  ;;  %p100_p1 = scmp.ne.s32.totalorder %s1442_s16, %s1438_s15 }
   0x5   : > { %p101_p2 = scmp.eq.s32.totalorder %s1551_s18, 1  ;;  %p1134_p3 = scmp.ge.s32.totalorder %s1446_s17, 1 }
   0x6   : > { %s1561_s22 = scalar_select %p88_p0, %s1442_s16, %s90_s21  }
   0x7   : > { %p1563_p4 = por %p101_p2, %p100_p1  ;;  %p174_p5 = scmp.lt.s32.totalorder %s1446_s17, 3 }
   0x9   : > { %p175_p6 = pnand %p1134_p3, %p174_p5 }
   0xa   : > { %s1577_s30 = smul.u32 (!%p175_p6), 20, %s1551_s18  ;;  %s198_s21 = sand.u32 (!%p175_p6), 1, %s1438_s15  }
   0xb   : > { %178 = sbr.rel (%p175_p6) target bundleno = 385 (0x181), region = 32 }
   0xc   : > { %p212_p7 = scmp.lt.s32.totalorder (!%p175_p6), %s1577_s30, 37  ;;  %s1196_s26 = smul.u32 (!%p175_p6), 160, %s198_s21 }
   0xe   : > { %s1675_s15 = scalar_lea.vmem (!%p175_p6), [#allocation2], %s1196_s26   ;;  %s1681_s27 = scalar_lea.vmem (!%p175_p6), [#allocation3], %s1196_s26  }
  0x10   : > { %v266_v0 = vld [vmem:[%s1974_s1 + $0x78] sm:$0xff]  ;;  %v265_v1 = vld [vmem:[%s1974_s1 + $0x70] sm:$0xff]  ;;  %v264_v2 = vld [vmem:[%s1974_s1 + $0x68] sm:$0xff]  ;;  %s213_s17 = scalar_select %p212_p7, %s1577_s30, 37  ;;  %vm279_vm0 = vcmask 523264   ;;  %v1512_v18 = vmov 0.0   ;;  %v269_v37 = vlaneseq }
  0x11   : > { %356 = vmatprep.subr.mxu0 %v266_v0  ;;  %1180 = vmatprep.subr.mxu1 %v266_v0  ;;  %v263_v3 = vld [vmem:[%s1974_s1 + $0x60] sm:$0xff]  ;;  %v262_v4 = vld [vmem:[%s1974_s1 + $0x58] sm:$0xff]  ;;  %v261_v5 = vld [vmem:[%s1974_s1 + $0x50] sm:$0xff]  ;;  %vm545_vm1 = vcmask 130048   ;;  %s578_s28 = ssub.s32 (%p1563_p4), 38, %s1577_s30  ;;  %s1178_s29 = smul.u32 (%p1563_p4), 160, %s1551_s18 }
  0x12   : > { %357 = vmatpush1.msra.mxu0 %v265_v1  ;;  %1188 = vmatpush1.msra.mxu1 %v265_v1  ;;  %v260_v6 = vld [vmem:[%s1974_s1 + $0x48] sm:$0xff]  ;;  %v259_v7 = vld [vmem:[%s1974_s1 + $0x40] sm:$0xff]  ;;  %v258_v8 = vld [vmem:[%s1974_s1 + $0x38] sm:$0xff]  ;;  %s1135_s5 = sshll.u32 %s213_s17, 3  ;;  %v270_v38 = vshrl.u32 %v269_v37, 7  ;;  %p579_p8 = scmp.lt.s32.totalorder (%p1563_p4), %s578_s28, 20 }
  0x13   : > { %358 = vmatprep.subr.mxu0 %v264_v2  ;;  %1181 = vmatprep.subr.mxu1 %v264_v2  ;;  %v257_v9 = vld [vmem:[%s1974_s1 + $0x30] sm:$0xff]  ;;  %v256_v10 = vld [vmem:[%s1974_s1 + $0x28] sm:$0xff]  ;;  %v255_v11 = vld [vmem:[%s1974_s1 + $0x20] sm:$0xff]  ;;  %s1620_s14 = scalar_lea.vmem %s1973_s0, %s1135_s5  ;;  %s1784_s7 = scalar_lea.vmem (%p1563_p4), %s1976_s3, %s1178_s29  }
  0x14   : > { %359 = vmatpush1.msra.mxu0 %v263_v3  ;;  %1189 = vmatpush1.msra.mxu1 %v263_v3  ;;  %v254_v12 = vld [vmem:[%s1974_s1 + $0x18] sm:$0xff]  ;;  %v253_v13 = vld [vmem:[%s1974_s1 + $0x10] sm:$0xff]  ;;  %v252_v14 = vld [vmem:[%s1974_s1 + $0x8] sm:$0xff]  ;;  %v271_v39 = vsub.s32 0, %v270_v38  ;;  %v275_v41 = vsub.s32 1, %v270_v38 }
  0x15   : > { %360 = vmatprep.subr.mxu0 %v262_v4  ;;  %1182 = vmatprep.subr.mxu1 %v262_v4  ;;  %v251_v15 = vld [vmem:[%s1974_s1] sm:$0xff]  ;;  %v241_v17 = vld [vmem:[%s1620_s14 + $0x50] sm:$0xff]  ;;  %v232_v19 = vld [vmem:[%s1620_s14 + $0x8] sm:$0xff] }
  0x16   : > { %361 = vmatpush1.msra.mxu0 %v261_v5  ;;  %1190 = vmatpush1.msra.mxu1 %v261_v5  ;;  %v231_v16 = vld [vmem:[%s1620_s14] sm:$0xff]  ;;  %v242_v20 = vld [vmem:[%s1620_s14 + $0x58] sm:$0xff]  ;;  %v233_v21 = vld [vmem:[%s1620_s14 + $0x10] sm:$0xff] }
  0x17   : > { %362 = vmatprep.subr.mxu0 %v260_v6  ;;  %1183 = vmatprep.subr.mxu1 %v260_v6  ;;  %v243_v22 = vld [vmem:[%s1620_s14 + $0x60] sm:$0xff]  ;;  %v234_v23 = vld [vmem:[%s1620_s14 + $0x18] sm:$0xff]  ;;  %v244_v24 = vld [vmem:[%s1620_s14 + $0x68] sm:$0xff] }
  0x18   : > { %363 = vmatpush1.msra.mxu0 %v259_v7  ;;  %1191 = vmatpush1.msra.mxu1 %v259_v7  ;;  %v235_v25 = vld [vmem:[%s1620_s14 + $0x20] sm:$0xff]  ;;  %v245_v26 = vld [vmem:[%s1620_s14 + $0x70] sm:$0xff]  ;;  %v236_v27 = vld [vmem:[%s1620_s14 + $0x28] sm:$0xff] }
  0x19   : > { %364 = vmatprep.subr.mxu0 %v258_v8  ;;  %1184 = vmatprep.subr.mxu1 %v258_v8  ;;  %v246_v28 = vld [vmem:[%s1620_s14 + $0x78] sm:$0xff]  ;;  %v237_v29 = vld [vmem:[%s1620_s14 + $0x30] sm:$0xff]  ;;  %v247_v30 = vld [vmem:[%s1620_s14 + $0x80] sm:$0xff] }
  0x1a   : > { %365 = vmatpush1.msra.mxu0 %v257_v9  ;;  %1192 = vmatpush1.msra.mxu1 %v257_v9  ;;  %v238_v31 = vld [vmem:[%s1620_s14 + $0x38] sm:$0xff]  ;;  %v248_v32 = vld [vmem:[%s1620_s14 + $0x88] sm:$0xff]  ;;  %v239_v33 = vld [vmem:[%s1620_s14 + $0x40] sm:$0xff] }
  0x1b   : > { %366 = vmatprep.subr.mxu0 %v256_v10  ;;  %1185 = vmatprep.subr.mxu1 %v256_v10  ;;  %v249_v34 = vld [vmem:[%s1620_s14 + $0x90] sm:$0xff]  ;;  %v240_v35 = vld [vmem:[%s1620_s14 + $0x48] sm:$0xff]  ;;  %v250_v36 = vld [vmem:[%s1620_s14 + $0x98] sm:$0xff] }
  0x1c   : > { %367 = vmatpush1.msra.mxu0 %v255_v11  ;;  %1193 = vmatpush1.msra.mxu1 %v255_v11  ;;  %v267_v40 = vld [vmem:[%s1975_s2] sm:$0x3] }
  0x1d   : > { %368 = vmatprep.subr.mxu0 %v254_v12  ;;  %1186 = vmatprep.subr.mxu1 %v254_v12  ;;  %v1669_v42 = vrot.slane %v267_v40, %v271_v39  ;;  %v1671_v43 = vrot.slane %v267_v40, %v275_v41 }
  0x1e   : > { %369 = vmatpush1.msra.mxu0 %v253_v13  ;;  %1194 = vmatpush1.msra.mxu1 %v253_v13 }
  0x1f   : > { %370 = vmatprep.subr.mxu0 %v252_v14  ;;  %1187 = vmatprep.subr.mxu1 %v252_v14 }
  0x20   : > { %371 = vmatpush1.msra.mxu0 %v251_v15  ;;  %1195 = vmatpush1.msra.mxu1 %v251_v15 }
  0x21   : > { %404 = vmatprep.mubr.f32.mxu0 %v1512_v18  ;;  %464 = vmatprep.mubr.f32.mxu1 %v1512_v18 }
  0x22   : > { %1136 = vmatmul.mubr.msk.f32.vlgmr.msra.gmra.mxu0 %vm279_vm0, %v231_v16  ;;  %1146 = vmatmul.mubr.msk.f32.vlgmr.msra.gmra.mxu1 %vm279_vm0, %v241_v17 }
  0x23   : > { %410 = vmatprep.mubr.f32.mxu0 %v1512_v18  ;;  %470 = vmatprep.mubr.f32.mxu1 %v1512_v18 }
  0x26   : > { %1137 = vmatmul.mubr.msk.f32.gmra.mxu0 %vm279_vm0, %v232_v19  ;;  %1147 = vmatmul.mubr.msk.f32.gmra.mxu1 %vm279_vm0, %v242_v20 }
  0x27   : > { %416 = vmatprep.mubr.f32.mxu0 %v1512_v18  ;;  %476 = vmatprep.mubr.f32.mxu1 %v1512_v18 }
  0x2a   : > { %1138 = vmatmul.mubr.msk.f32.gmra.mxu0 %vm279_vm0, %v233_v21  ;;  %1148 = vmatmul.mubr.msk.f32.gmra.mxu1 %vm279_vm0, %v243_v22 }
  0x2b   : > { %422 = vmatprep.mubr.f32.mxu0 %v1512_v18  ;;  %482 = vmatprep.mubr.f32.mxu1 %v1512_v18 }
  0x2e   : > { %1139 = vmatmul.mubr.msk.f32.gmra.mxu0 %vm279_vm0, %v234_v23  ;;  %1149 = vmatmul.mubr.msk.f32.gmra.mxu1 %vm279_vm0, %v244_v24 }
  0x2f   : > { %428 = vmatprep.mubr.f32.mxu0 %v1512_v18  ;;  %488 = vmatprep.mubr.f32.mxu1 %v1512_v18 }
  0x32   : > { %1140 = vmatmul.mubr.msk.f32.gmra.mxu0 %vm279_vm0, %v235_v25  ;;  %1150 = vmatmul.mubr.msk.f32.gmra.mxu1 %vm279_vm0, %v245_v26 }
  0x33   : > { %434 = vmatprep.mubr.f32.mxu0 %v1512_v18  ;;  %494 = vmatprep.mubr.f32.mxu1 %v1512_v18 }
  0x36   : > { %1141 = vmatmul.mubr.msk.f32.gmra.mxu0 %vm279_vm0, %v236_v27  ;;  %1151 = vmatmul.mubr.msk.f32.gmra.mxu1 %vm279_vm0, %v246_v28 }
  0x37   : > { %440 = vmatprep.mubr.f32.mxu0 %v1512_v18  ;;  %500 = vmatprep.mubr.f32.mxu1 %v1512_v18 }
  0x3a   : > { %1142 = vmatmul.mubr.msk.f32.gmra.mxu0 %vm279_vm0, %v237_v29  ;;  %1152 = vmatmul.mubr.msk.f32.gmra.mxu1 %vm279_vm0, %v247_v30 }
  0x3b   : > { %446 = vmatprep.mubr.f32.mxu0 %v1512_v18  ;;  %506 = vmatprep.mubr.f32.mxu1 %v1512_v18 }
  0x3e   : > { %1143 = vmatmul.mubr.msk.f32.gmra.mxu0 %vm279_vm0, %v238_v31  ;;  %1153 = vmatmul.mubr.msk.f32.gmra.mxu1 %vm279_vm0, %v248_v32 }
  0x3f   : > { %452 = vmatprep.mubr.f32.mxu0 %v1512_v18  ;;  %512 = vmatprep.mubr.f32.mxu1 %v1512_v18 }
  0x42   : > { %1144 = vmatmul.mubr.msk.f32.gmra.mxu0 %vm279_vm0, %v239_v33  ;;  %1154 = vmatmul.mubr.msk.f32.gmra.mxu1 %vm279_vm0, %v249_v34 }
  0x43   : > { %458 = vmatprep.mubr.f32.mxu0 %v1512_v18  ;;  %518 = vmatprep.mubr.f32.mxu1 %v1512_v18 }
  0x46   : > { %1145 = vmatmul.mubr.msk.f32.gmra.mxu0 %vm279_vm0, %v240_v35  ;;  %1155 = vmatmul.mubr.msk.f32.gmra.mxu1 %vm279_vm0, %v250_v36 }
  0xe2   : > { %v406_v44 = vpop.f32.mrf.mxu0  ;;  %v466_v45 = vpop.f32.mrf.mxu1 }
  0xe3   : > { %v407_v46 = vadd.f32 %v406_v44, %v1669_v42  ;;  %v467_v47 = vadd.f32 %v466_v45, %v1669_v42 }
  0xe4   : > { %v408_v48 = vpop.f32.mrf.mxu0  ;;  %v468_v49 = vpop.f32.mrf.mxu1 }
  0xe5   : > { %525 = vst [vmem:[%s1675_s15] sm:$0xff] %v407_v46  ;;  %535 = vst [vmem:[%s1675_s15 + $0x50] sm:$0xff] %v467_v47  ;;  %v409_v50 = vadd.f32 %v408_v48, %v1671_v43  ;;  %v469_v51 = vadd.f32 %v468_v49, %v1671_v43 }
  0xe6   : > { %v412_v52 = vpop.f32.mrf.mxu0  ;;  %v472_v53 = vpop.f32.mrf.mxu1 }
  0xe7   : > { %546 = vst.msk [vmem:[%s1681_s27] sm:$0xff] %vm545_vm1, %v409_v50  ;;  %556 = vst.msk [vmem:[%s1681_s27 + $0x50] sm:$0xff] %vm545_vm1, %v469_v51  ;;  %v413_v54 = vadd.f32 %v412_v52, %v1669_v42  ;;  %v473_v55 = vadd.f32 %v472_v53, %v1669_v42 }
  0xe8   : > { %v414_v56 = vpop.f32.mrf.mxu0  ;;  %v474_v57 = vpop.f32.mrf.mxu1 }
  0xe9   : > { %526 = vst [vmem:[%s1675_s15 + $0x8] sm:$0xff] %v413_v54  ;;  %536 = vst [vmem:[%s1675_s15 + $0x58] sm:$0xff] %v473_v55  ;;  %v415_v58 = vadd.f32 %v414_v56, %v1671_v43  ;;  %v475_v59 = vadd.f32 %v474_v57, %v1671_v43 }
  0xea   : > { %v418_v60 = vpop.f32.mrf.mxu0  ;;  %v478_v61 = vpop.f32.mrf.mxu1 }
  0xeb   : > { %547 = vst.msk [vmem:[%s1681_s27 + $0x8] sm:$0xff] %vm545_vm1, %v415_v58  ;;  %557 = vst.msk [vmem:[%s1681_s27 + $0x58] sm:$0xff] %vm545_vm1, %v475_v59  ;;  %v419_v62 = vadd.f32 %v418_v60, %v1669_v42  ;;  %v479_v63 = vadd.f32 %v478_v61, %v1669_v42 }
  0xec   : > { %v420_v0 = vpop.f32.mrf.mxu0  ;;  %v480_v1 = vpop.f32.mrf.mxu1 }
  0xed   : > { %527 = vst [vmem:[%s1675_s15 + $0x10] sm:$0xff] %v419_v62  ;;  %537 = vst [vmem:[%s1675_s15 + $0x60] sm:$0xff] %v479_v63  ;;  %v421_v2 = vadd.f32 %v420_v0, %v1671_v43  ;;  %v481_v3 = vadd.f32 %v480_v1, %v1671_v43 }
  0xee   : > { %v424_v4 = vpop.f32.mrf.mxu0  ;;  %v484_v5 = vpop.f32.mrf.mxu1 }
  0xef   : > { %548 = vst.msk [vmem:[%s1681_s27 + $0x10] sm:$0xff] %vm545_vm1, %v421_v2  ;;  %558 = vst.msk [vmem:[%s1681_s27 + $0x60] sm:$0xff] %vm545_vm1, %v481_v3  ;;  %v425_v6 = vadd.f32 %v424_v4, %v1669_v42  ;;  %v485_v7 = vadd.f32 %v484_v5, %v1669_v42 }
  0xf0   : > { %v426_v8 = vpop.f32.mrf.mxu0  ;;  %v486_v9 = vpop.f32.mrf.mxu1 }
  0xf1   : > { %528 = vst [vmem:[%s1675_s15 + $0x18] sm:$0xff] %v425_v6  ;;  %538 = vst [vmem:[%s1675_s15 + $0x68] sm:$0xff] %v485_v7  ;;  %v427_v10 = vadd.f32 %v426_v8, %v1671_v43  ;;  %v487_v11 = vadd.f32 %v486_v9, %v1671_v43 }
  0xf2   : > { %v430_v12 = vpop.f32.mrf.mxu0  ;;  %v490_v13 = vpop.f32.mrf.mxu1 }
  0xf3   : > { %549 = vst.msk [vmem:[%s1681_s27 + $0x18] sm:$0xff] %vm545_vm1, %v427_v10  ;;  %559 = vst.msk [vmem:[%s1681_s27 + $0x68] sm:$0xff] %vm545_vm1, %v487_v11  ;;  %v431_v14 = vadd.f32 %v430_v12, %v1669_v42  ;;  %v491_v15 = vadd.f32 %v490_v13, %v1669_v42 }
  0xf4   : > { %v432_v16 = vpop.f32.mrf.mxu0  ;;  %v492_v17 = vpop.f32.mrf.mxu1 }
  0xf5   : > { %529 = vst [vmem:[%s1675_s15 + $0x20] sm:$0xff] %v431_v14  ;;  %539 = vst [vmem:[%s1675_s15 + $0x70] sm:$0xff] %v491_v15  ;;  %v433_v18 = vadd.f32 %v432_v16, %v1671_v43  ;;  %v493_v19 = vadd.f32 %v492_v17, %v1671_v43 }
  0xf6   : > { %v436_v20 = vpop.f32.mrf.mxu0  ;;  %v496_v21 = vpop.f32.mrf.mxu1 }
  0xf7   : > { %550 = vst.msk [vmem:[%s1681_s27 + $0x20] sm:$0xff] %vm545_vm1, %v433_v18  ;;  %560 = vst.msk [vmem:[%s1681_s27 + $0x70] sm:$0xff] %vm545_vm1, %v493_v19  ;;  %v437_v22 = vadd.f32 %v436_v20, %v1669_v42  ;;  %v497_v23 = vadd.f32 %v496_v21, %v1669_v42 }
  0xf8   : > { %v438_v24 = vpop.f32.mrf.mxu0  ;;  %v498_v25 = vpop.f32.mrf.mxu1 }
  0xf9   : > { %530 = vst [vmem:[%s1675_s15 + $0x28] sm:$0xff] %v437_v22  ;;  %540 = vst [vmem:[%s1675_s15 + $0x78] sm:$0xff] %v497_v23  ;;  %v439_v26 = vadd.f32 %v438_v24, %v1671_v43  ;;  %v499_v27 = vadd.f32 %v498_v25, %v1671_v43 }
  0xfa   : > { %v442_v28 = vpop.f32.mrf.mxu0  ;;  %v502_v29 = vpop.f32.mrf.mxu1 }
  0xfb   : > { %551 = vst.msk [vmem:[%s1681_s27 + $0x28] sm:$0xff] %vm545_vm1, %v439_v26  ;;  %561 = vst.msk [vmem:[%s1681_s27 + $0x78] sm:$0xff] %vm545_vm1, %v499_v27  ;;  %v443_v30 = vadd.f32 %v442_v28, %v1669_v42  ;;  %v503_v31 = vadd.f32 %v502_v29, %v1669_v42 }
  0xfc   : > { %v444_v32 = vpop.f32.mrf.mxu0  ;;  %v504_v33 = vpop.f32.mrf.mxu1 }
  0xfd   : > { %531 = vst [vmem:[%s1675_s15 + $0x30] sm:$0xff] %v443_v30  ;;  %541 = vst [vmem:[%s1675_s15 + $0x80] sm:$0xff] %v503_v31  ;;  %v445_v34 = vadd.f32 %v444_v32, %v1671_v43  ;;  %v505_v35 = vadd.f32 %v504_v33, %v1671_v43 }
  0xfe   : > { %v448_v36 = vpop.f32.mrf.mxu0  ;;  %v508_v37 = vpop.f32.mrf.mxu1 }
  0xff   : > { %552 = vst.msk [vmem:[%s1681_s27 + $0x30] sm:$0xff] %vm545_vm1, %v445_v34  ;;  %562 = vst.msk [vmem:[%s1681_s27 + $0x80] sm:$0xff] %vm545_vm1, %v505_v35  ;;  %v449_v38 = vadd.f32 %v448_v36, %v1669_v42  ;;  %v509_v39 = vadd.f32 %v508_v37, %v1669_v42 }
 0x100   : > { %v450_v40 = vpop.f32.mrf.mxu0  ;;  %v510_v41 = vpop.f32.mrf.mxu1 }
 0x101   : > { %532 = vst [vmem:[%s1675_s15 + $0x38] sm:$0xff] %v449_v38  ;;  %542 = vst [vmem:[%s1675_s15 + $0x88] sm:$0xff] %v509_v39  ;;  %v451_v44 = vadd.f32 %v450_v40, %v1671_v43  ;;  %v511_v45 = vadd.f32 %v510_v41, %v1671_v43 }
 0x102   : > { %v454_v46 = vpop.f32.mrf.mxu0  ;;  %v514_v47 = vpop.f32.mrf.mxu1 }
 0x103   : > { %553 = vst.msk [vmem:[%s1681_s27 + $0x38] sm:$0xff] %vm545_vm1, %v451_v44  ;;  %563 = vst.msk [vmem:[%s1681_s27 + $0x88] sm:$0xff] %vm545_vm1, %v511_v45  ;;  %v455_v48 = vadd.f32 %v454_v46, %v1669_v42  ;;  %v515_v49 = vadd.f32 %v514_v47, %v1669_v42 }
 0x104   : > { %v456_v50 = vpop.f32.mrf.mxu0  ;;  %v516_v51 = vpop.f32.mrf.mxu1 }
 0x105   : > { %533 = vst [vmem:[%s1675_s15 + $0x40] sm:$0xff] %v455_v48  ;;  %543 = vst [vmem:[%s1675_s15 + $0x90] sm:$0xff] %v515_v49  ;;  %v457_v52 = vadd.f32 %v456_v50, %v1671_v43  ;;  %v517_v53 = vadd.f32 %v516_v51, %v1671_v43 }
 0x106   : > { %v460_v54 = vpop.f32.mrf.mxu0  ;;  %v520_v55 = vpop.f32.mrf.mxu1 }
 0x107   : > { %554 = vst.msk [vmem:[%s1681_s27 + $0x40] sm:$0xff] %vm545_vm1, %v457_v52  ;;  %564 = vst.msk [vmem:[%s1681_s27 + $0x90] sm:$0xff] %vm545_vm1, %v517_v53  ;;  %v461_v56 = vadd.f32 %v460_v54, %v1669_v42  ;;  %v521_v57 = vadd.f32 %v520_v55, %v1669_v42  ;;  %576 = sbr.rel (!%p1563_p4) target bundleno = 324 (0x144), region = 36 }
 0x108   : > { %v462_v58 = vpop.f32.mrf.mxu0  ;;  %v522_v59 = vpop.f32.mrf.mxu1 }
 0x109   : > { %534 = vst [vmem:[%s1675_s15 + $0x48] sm:$0xff] %v461_v56  ;;  %544 = vst [vmem:[%s1675_s15 + $0x98] sm:$0xff] %v521_v57  ;;  %v463_v60 = vadd.f32 %v462_v58, %v1671_v43  ;;  %v523_v61 = vadd.f32 %v522_v59, %v1671_v43 }
 0x10b   : > { %555 = vst.msk [vmem:[%s1681_s27 + $0x48] sm:$0xff] %vm545_vm1, %v463_v60  ;;  %565 = vst.msk [vmem:[%s1681_s27 + $0x98] sm:$0xff] %vm545_vm1, %v523_v61 }
 0x10c   : > { %s1989_s28 = smov (!%p579_p8, %s578_s28), 20 }
 0x10d   : > { %s1156_s8 = sshll.u32 %s1989_s28, 7 }
 0x10e   : > { %p1159_p9 = scmp.eq.s32.totalorder %s1156_s8, 0 }
 0x10f   : > { %1352 = sdivrem.u32 (!%p1159_p9), %s1989_s28, 20 }
 0x110   : > { %587 = sbr.rel (%p1159_p9) target bundleno = 324 (0x144), region = 40 }
 0x118   : > { %s1790_s9 = spop.drf %1352 }
 0x119   : > { %p1160_p10 = scmp.le.s32.totalorder %s1790_s9, 0 }
 0x11a   : > { %s1979_s10 = smov (!%p1160_p10), %s1784_s7  ;;  %s1980_s11 = smov (!%p1160_p10), %s1675_s15 }
 0x11b   : > { %1050 = sbr.rel (%p1160_p10) target bundleno = 299 (0x12b), region = 188  ;;  %s1799_s12 = smov (!%p1160_p10), 0  }
 0x11c   : > { %s1801_s13 = smov (!%p1160_p10), 0  }
 0x120 LB: >> { %v690_v42 = vld [vmem:[%s1454_s11] sm:$0xff]  ;;  %v692_v43 = vld [vmem:[%s1454_s11 + $0x8] sm:$0xff]  ;;  %v694_v62 = vld [vmem:[%s1454_s11 + $0x10] sm:$0xff]  ;;  %s730_s14 = sadd.s32 1, %s1458_s12  ;;  %s684_s13 = sadd.s32 1, %s1462_s13   ;;  %s1462_s13 = sphi %s1801_s13, %s684_s13   ;;  %s1458_s12 = sphi %s1799_s12, %s1981_s12   ;;  %s1454_s11 = sphi %s1980_s11, %s735_s11   ;;  %s1450_s10 = sphi %s1979_s10, %s736_s10  }
 0x121   : >> { %691 = vst [vmem:[%s1450_s10] sm:$0xff] %v690_v42  ;;  %693 = vst [vmem:[%s1450_s10 + $0x8] sm:$0xff] %v692_v43  ;;  %v696_v63 = vld [vmem:[%s1454_s11 + $0x18] sm:$0xff]  ;;  %v698_v0 = vld [vmem:[%s1454_s11 + $0x20] sm:$0xff]  ;;  %p731_p11 = scmp.ge.s32.totalorder %s730_s14, %s1790_s9  ;;  %p683_p12 = scmp.ge.s32.totalorder %s684_s13, %s1790_s9 }
 0x122   : >> { %695 = vst [vmem:[%s1450_s10 + $0x10] sm:$0xff] %v694_v62  ;;  %v700_v1 = vld [vmem:[%s1454_s11 + $0x28] sm:$0xff]  ;;  %697 = vst [vmem:[%s1450_s10 + $0x18] sm:$0xff] %v696_v63  ;;  %v702_v2 = vld [vmem:[%s1454_s11 + $0x30] sm:$0xff] }
 0x123   : >> { %699 = vst [vmem:[%s1450_s10 + $0x20] sm:$0xff] %v698_v0  ;;  %701 = vst [vmem:[%s1450_s10 + $0x28] sm:$0xff] %v700_v1  ;;  %v704_v3 = vld [vmem:[%s1454_s11 + $0x38] sm:$0xff]  ;;  %v706_v4 = vld [vmem:[%s1454_s11 + $0x40] sm:$0xff]  ;;  %s1991_s14 = smov (%p731_p11, %s730_s14), 0 }
 0x124   : >> { %703 = vst [vmem:[%s1450_s10 + $0x30] sm:$0xff] %v702_v2  ;;  %705 = vst [vmem:[%s1450_s10 + $0x38] sm:$0xff] %v704_v3  ;;  %v708_v5 = vld [vmem:[%s1454_s11 + $0x48] sm:$0xff]  ;;  %v710_v6 = vld [vmem:[%s1454_s11 + $0x50] sm:$0xff]  ;;  %s733_s17 = smul.u32 160, %s1991_s14  ;;  %s1981_s12 = smov %s1991_s14 }
 0x125   : >> { %707 = vst [vmem:[%s1450_s10 + $0x40] sm:$0xff] %v706_v4  ;;  %v712_v7 = vld [vmem:[%s1454_s11 + $0x58] sm:$0xff]  ;;  %709 = vst [vmem:[%s1450_s10 + $0x48] sm:$0xff] %v708_v5  ;;  %v714_v8 = vld [vmem:[%s1454_s11 + $0x60] sm:$0xff] }
 0x126   : >> { %711 = vst [vmem:[%s1450_s10 + $0x50] sm:$0xff] %v710_v6  ;;  %713 = vst [vmem:[%s1450_s10 + $0x58] sm:$0xff] %v712_v7  ;;  %v716_v9 = vld [vmem:[%s1454_s11 + $0x68] sm:$0xff]  ;;  %v718_v10 = vld [vmem:[%s1454_s11 + $0x70] sm:$0xff]  ;;  %686 = sbr.rel (!%p683_p12) target bundleno = 288 (0x120), region = 194 }
 0x127   : >> { %715 = vst [vmem:[%s1450_s10 + $0x60] sm:$0xff] %v714_v8  ;;  %717 = vst [vmem:[%s1450_s10 + $0x68] sm:$0xff] %v716_v9  ;;  %v720_v11 = vld [vmem:[%s1454_s11 + $0x78] sm:$0xff]  ;;  %v722_v12 = vld [vmem:[%s1454_s11 + $0x80] sm:$0xff] }
 0x128   : >> { %719 = vst [vmem:[%s1450_s10 + $0x70] sm:$0xff] %v718_v10  ;;  %v724_v13 = vld [vmem:[%s1454_s11 + $0x88] sm:$0xff]  ;;  %721 = vst [vmem:[%s1450_s10 + $0x78] sm:$0xff] %v720_v11  ;;  %v726_v14 = vld [vmem:[%s1454_s11 + $0x90] sm:$0xff] }
 0x129   : >> { %723 = vst [vmem:[%s1450_s10 + $0x80] sm:$0xff] %v722_v12  ;;  %725 = vst [vmem:[%s1450_s10 + $0x88] sm:$0xff] %v724_v13  ;;  %v728_v15 = vld [vmem:[%s1454_s11 + $0x98] sm:$0xff]  ;;  %s735_s11 = scalar_lea.vmem %s1675_s15, %s733_s17 [#allocation2]  }
 0x12a   : >> { %727 = vst [vmem:[%s1450_s10 + $0x90] sm:$0xff] %v726_v14  ;;  %729 = vst [vmem:[%s1450_s10 + $0x98] sm:$0xff] %v728_v15  ;;  %s736_s10 = scalar_lea.vmem %s1784_s7, %s733_s17  }
 0x12b PF: > { %1354 = sdivrem.u32 %s1989_s28, 20 }
 0x12c   : > { %s1161_s20 = smul.u32 160, %s1790_s9 }
 0x12e   : > { %s741_s21 = scalar_lea.vmem %s1675_s15, %s1161_s20 [#allocation2]   ;;  %s743_s24 = scalar_lea.vmem %s1784_s7, %s1161_s20  }
 0x134   : > { %s1355_s25 = spop.drf %1354 }
 0x135   : > { %p1163_p13 = scmp.le.s32.totalorder %s1355_s25, 0 }
 0x136   : > { %s1464_s26 = smov (!%p1163_p13), %s743_s24   ;;  %s1468_s29 = smov (!%p1163_p13), %s741_s21  }
 0x137   : > { %1064 = sbr.rel (%p1163_p13) target bundleno = 324 (0x144), region = 199  ;;  %s1472_s5 = smov (!%p1163_p13), 0  }
 0x138   : > { %s1476_s6 = smov (!%p1163_p13), 0  }
 0x13c LB: >> { %v753_v16 = vld [vmem:[%s1470_s29] sm:$0xff]  ;;  %s755_s8 = sadd.s32 1, %s1474_s5  ;;  %s747_s6 = sadd.s32 1, %s1478_s6   ;;  %s1478_s6 = sphi %s1476_s6, %s747_s6   ;;  %s1474_s5 = sphi %s1472_s5, %s1473_s5   ;;  %s1470_s29 = sphi %s1468_s29, %s760_s29   ;;  %s1466_s26 = sphi %s1464_s26, %s761_s26  }
 0x13d   : >> { %754 = vst [vmem:[%s1466_s26] sm:$0xff] %v753_v16  ;;  %p756_p0 = scmp.ge.s32.totalorder %s755_s8, %s1355_s25  ;;  %p746_p1 = scmp.ge.s32.totalorder %s747_s6, %s1355_s25 }
 0x13f   : >> { %s1993_s8 = smov (%p756_p0, %s755_s8), 0  ;;  %749 = sbr.rel (!%p746_p1) target bundleno = 316 (0x13c), region = 205 }
 0x140   : >> { %s1164_s15 = sshll.u32 %s1993_s8, 3  ;;  %s1473_s5 = smov %s1993_s8  }
 0x141   : >> { %s760_s29 = scalar_lea.vmem %s741_s21, %s1164_s15 [#allocation2]   ;;  %s761_s26 = scalar_lea.vmem %s743_s24, %s1164_s15  }
 0x144 PF: > { %767 = sbr.rel (!%p1563_p4) target bundleno = 385 (0x181), region = 88  ;;  %s769_s28 = ssub.s32 (%p1563_p4), 38, %s1577_s30 }
 0x145   : > { %s1179_s7 = smul.u32 (%p1563_p4), 160, %s1551_s18  ;;  %p770_p2 = scmp.lt.s32.totalorder (%p1563_p4), %s769_s28, 20 }
 0x147   : > { %s1877_s11 = scalar_lea.vmem (%p1563_p4), %s1977_s4, %s1179_s7  }
 0x149   : > { %s1995_s28 = smov (!%p770_p2, %s769_s28), 20 }
 0x14a   : > { %s1166_s12 = sshll.u32 %s1995_s28, 7 }
 0x14b   : > { %p1169_p3 = scmp.eq.s32.totalorder %s1166_s12, 0 }
 0x14c   : > { %1356 = sdivrem.u32 (!%p1169_p3), %s1995_s28, 20 }
 0x14d   : > { %778 = sbr.rel (%p1169_p3) target bundleno = 385 (0x181), region = 92 }
 0x155   : > { %s1883_s23 = spop.drf %1356 }
 0x156   : > { %p1170_p4 = scmp.le.s32.totalorder %s1883_s23, 0 }
 0x157   : > { %s1982_s18 = smov (!%p1170_p4), %s1877_s11  ;;  %s1983_s30 = smov (!%p1170_p4), %s1681_s27 }
 0x158   : > { %1078 = sbr.rel (%p1170_p4) target bundleno = 360 (0x168), region = 210  ;;  %s1892_s13 = smov (!%p1170_p4), 0  }
 0x159   : > { %s1894_s14 = smov (!%p1170_p4), 0  }
 0x15d LB: >> { %v881_v17 = vld [vmem:[%s1486_s30] sm:$0xff]  ;;  %v883_v18 = vld [vmem:[%s1486_s30 + $0x8] sm:$0xff]  ;;  %v885_v19 = vld [vmem:[%s1486_s30 + $0x10] sm:$0xff]  ;;  %s921_s17 = sadd.s32 1, %s1490_s13  ;;  %s875_s14 = sadd.s32 1, %s1494_s14   ;;  %s1494_s14 = sphi %s1894_s14, %s875_s14   ;;  %s1490_s13 = sphi %s1892_s13, %s1984_s13   ;;  %s1486_s30 = sphi %s1983_s30, %s926_s30   ;;  %s1482_s18 = sphi %s1982_s18, %s927_s18  }
 0x15e   : >> { %882 = vst [vmem:[%s1482_s18] sm:$0xff] %v881_v17  ;;  %884 = vst [vmem:[%s1482_s18 + $0x8] sm:$0xff] %v883_v18  ;;  %v887_v20 = vld [vmem:[%s1486_s30 + $0x18] sm:$0xff]  ;;  %v889_v21 = vld [vmem:[%s1486_s30 + $0x20] sm:$0xff]  ;;  %p922_p5 = scmp.ge.s32.totalorder %s921_s17, %s1883_s23  ;;  %p874_p6 = scmp.ge.s32.totalorder %s875_s14, %s1883_s23 }
 0x15f   : >> { %886 = vst [vmem:[%s1482_s18 + $0x10] sm:$0xff] %v885_v19  ;;  %v891_v22 = vld [vmem:[%s1486_s30 + $0x28] sm:$0xff]  ;;  %888 = vst [vmem:[%s1482_s18 + $0x18] sm:$0xff] %v887_v20  ;;  %v893_v23 = vld [vmem:[%s1486_s30 + $0x30] sm:$0xff] }
 0x160   : >> { %890 = vst [vmem:[%s1482_s18 + $0x20] sm:$0xff] %v889_v21  ;;  %892 = vst [vmem:[%s1482_s18 + $0x28] sm:$0xff] %v891_v22  ;;  %v895_v24 = vld [vmem:[%s1486_s30 + $0x38] sm:$0xff]  ;;  %v897_v25 = vld [vmem:[%s1486_s30 + $0x40] sm:$0xff]  ;;  %s1997_s17 = smov (%p922_p5, %s921_s17), 0 }
 0x161   : >> { %894 = vst [vmem:[%s1482_s18 + $0x30] sm:$0xff] %v893_v23  ;;  %896 = vst [vmem:[%s1482_s18 + $0x38] sm:$0xff] %v895_v24  ;;  %v899_v26 = vld [vmem:[%s1486_s30 + $0x48] sm:$0xff]  ;;  %v901_v27 = vld [vmem:[%s1486_s30 + $0x50] sm:$0xff]  ;;  %s924_s20 = smul.u32 160, %s1997_s17  ;;  %s1984_s13 = smov %s1997_s17 }
 0x162   : >> { %898 = vst [vmem:[%s1482_s18 + $0x40] sm:$0xff] %v897_v25  ;;  %v903_v28 = vld [vmem:[%s1486_s30 + $0x58] sm:$0xff]  ;;  %900 = vst [vmem:[%s1482_s18 + $0x48] sm:$0xff] %v899_v26  ;;  %v905_v29 = vld [vmem:[%s1486_s30 + $0x60] sm:$0xff] }
 0x163   : >> { %902 = vst [vmem:[%s1482_s18 + $0x50] sm:$0xff] %v901_v27  ;;  %904 = vst [vmem:[%s1482_s18 + $0x58] sm:$0xff] %v903_v28  ;;  %v907_v30 = vld [vmem:[%s1486_s30 + $0x68] sm:$0xff]  ;;  %v909_v31 = vld [vmem:[%s1486_s30 + $0x70] sm:$0xff]  ;;  %877 = sbr.rel (!%p874_p6) target bundleno = 349 (0x15d), region = 216 }
 0x164   : >> { %906 = vst [vmem:[%s1482_s18 + $0x60] sm:$0xff] %v905_v29  ;;  %908 = vst [vmem:[%s1482_s18 + $0x68] sm:$0xff] %v907_v30  ;;  %v911_v32 = vld [vmem:[%s1486_s30 + $0x78] sm:$0xff]  ;;  %v913_v33 = vld [vmem:[%s1486_s30 + $0x80] sm:$0xff] }
 0x165   : >> { %910 = vst [vmem:[%s1482_s18 + $0x70] sm:$0xff] %v909_v31  ;;  %v915_v34 = vld [vmem:[%s1486_s30 + $0x88] sm:$0xff]  ;;  %912 = vst [vmem:[%s1482_s18 + $0x78] sm:$0xff] %v911_v32  ;;  %v917_v35 = vld [vmem:[%s1486_s30 + $0x90] sm:$0xff] }
 0x166   : >> { %914 = vst [vmem:[%s1482_s18 + $0x80] sm:$0xff] %v913_v33  ;;  %916 = vst [vmem:[%s1482_s18 + $0x88] sm:$0xff] %v915_v34  ;;  %v919_v36 = vld [vmem:[%s1486_s30 + $0x98] sm:$0xff]  ;;  %s926_s30 = scalar_lea.vmem %s1681_s27, %s924_s20 [#allocation3]  }
 0x167   : >> { %918 = vst [vmem:[%s1482_s18 + $0x90] sm:$0xff] %v917_v35  ;;  %920 = vst [vmem:[%s1482_s18 + $0x98] sm:$0xff] %v919_v36  ;;  %s927_s18 = scalar_lea.vmem %s1877_s11, %s924_s20  }
 0x168 PF: > { %1358 = sdivrem.u32 %s1995_s28, 20 }
 0x169   : > { %s1171_s21 = smul.u32 160, %s1883_s23 }
 0x16b   : > { %s932_s24 = scalar_lea.vmem %s1681_s27, %s1171_s21 [#allocation3]   ;;  %s934_s25 = scalar_lea.vmem %s1877_s11, %s1171_s21  }
 0x171   : > { %s1359_s26 = spop.drf %1358 }
 0x172   : > { %p1173_p7 = scmp.le.s32.totalorder %s1359_s26, 0 }
 0x173   : > { %s1496_s29 = smov (!%p1173_p7), %s934_s25   ;;  %s1500_s5 = smov (!%p1173_p7), %s932_s24  }
 0x174   : > { %1092 = sbr.rel (%p1173_p7) target bundleno = 385 (0x181), region = 221  ;;  %s1504_s6 = smov (!%p1173_p7), 0  }
 0x175   : > { %s1508_s8 = smov (!%p1173_p7), 0  }
 0x179 LB: >> { %v944_v37 = vld [vmem:[%s1502_s5] sm:$0xff]  ;;  %s946_s15 = sadd.s32 1, %s1506_s6  ;;  %s938_s8 = sadd.s32 1, %s1510_s8   ;;  %s1510_s8 = sphi %s1508_s8, %s938_s8   ;;  %s1506_s6 = sphi %s1504_s6, %s1505_s6   ;;  %s1502_s5 = sphi %s1500_s5, %s951_s5   ;;  %s1498_s29 = sphi %s1496_s29, %s952_s29  }
 0x17a   : >> { %945 = vst [vmem:[%s1498_s29] sm:$0xff] %v944_v37  ;;  %p947_p8 = scmp.ge.s32.totalorder %s946_s15, %s1359_s26  ;;  %p937_p9 = scmp.ge.s32.totalorder %s938_s8, %s1359_s26 }
 0x17c   : >> { %s1999_s15 = smov (%p947_p8, %s946_s15), 0  ;;  %940 = sbr.rel (!%p937_p9) target bundleno = 377 (0x179), region = 227 }
 0x17d   : >> { %s1174_s27 = sshll.u32 %s1999_s15, 3  ;;  %s1505_s6 = smov %s1999_s15  }
 0x17e   : >> { %s951_s5 = scalar_lea.vmem %s932_s24, %s1174_s27 [#allocation3]   ;;  %s952_s29 = scalar_lea.vmem %s934_s25, %s1174_s27  }
 0x181 PF: > { %p12_p10 = scmp.ge.s32.totalorder %s1553_s19, 4   ;;  %s1985_s15 = smov %s1442_s16 }
 0x182   : > { %s1986_s16 = smov %s1561_s22  ;;  %s1987_s17 = smov %s1553_s19 }
 0x183   :  { %14 = sbr.rel (!%p12_p10) target bundleno = 2 (0x2), region = 238 }

</bundles_post_ra>
